<compile_context>
chip_gen: v5e
topology: v5e:2x2
jax: 0.10.0
libtpu: 0.0.40
codegen_flags: <defaults>
</compile_context>

<pallas_src>
import functools

import jax
import jax.numpy as jnp
import numpy as np
from jax.experimental import pallas as pl
from jax.experimental.pallas import tpu as pltpu


def _round_up(v, m):
    return ((v + m - 1) // m) * m


def _rnn_kernel(x_ref, mh_ref, bh_ref, wox_ref, woh_ref, bo_ref, logp_ref,
                *, num_class, hp):
    """Collapsed-recurrence RNN forward; whole (tiny) problem resident in VMEM.

    x_ref   : (B, T*Hp)        inputs, lane-padded per step, flattened t-major
    mh_ref  : ((T-1)*Hp, Hp)   stacked Whx @ Whh^(T-2-t) blocks (precomputed)
    bh_ref  : (1, Hp)          bh @ sum_k Whh^k (precomputed effective bias)
    wox_ref : (Hp, Cp)         i2o weight rows acting on x_{T-1}
    woh_ref : (Hp, Cp)         i2o weight rows acting on h_{T-1}
    bo_ref  : (1, Cp)          i2o bias
    logp_ref: (B, Cp)          log-softmax of last-step logits (padded lanes ~ -1e30)
    """
    B, THp = x_ref.shape
    Cp = logp_ref.shape[1]

    x = x_ref[...]
    x_hist = x[:, :THp - hp]          # (B, (T-1)*Hp)  static, 128-aligned lane slice
    x_last = x[:, THp - hp:]          # (B, Hp)

    # The entire serial recurrence as ONE wide MXU matmul (no dependent chain).
    h = (jnp.dot(x_hist, mh_ref[...], preferred_element_type=jnp.float32)
         + bh_ref[...])

    # logits = i2o(cat(x_{T-1}, h_{T-1}))
    logits = (jnp.dot(x_last, wox_ref[...], preferred_element_type=jnp.float32)
              + jnp.dot(h, woh_ref[...], preferred_element_type=jnp.float32)
              + bo_ref[...])                          # (B, Cp)

    # Mask padded class lanes, then numerically stable log_softmax (f32 VPU/EUP).
    cls = jax.lax.broadcasted_iota(jnp.int32, (B, Cp), 1)
    logits = jnp.where(cls < num_class, logits, jnp.float32(-1e30))
    m = jnp.max(logits, axis=1, keepdims=True)
    shifted = logits - m
    lse = jnp.log(jnp.sum(jnp.exp(shifted), axis=1, keepdims=True))
    logp_ref[...] = shifted - lse


def prepare_params(wh, bh, wo, bo, seq_len):
    """One-time weight preprocessing (off the per-call path).

    wh: (H, 2H) i2h.weight, bh: (H,), wo: (C, 2H) i2o.weight, bo: (C,).
    """
    T = seq_len
    assert T >= 2, "recurrence fold assumes at least two time steps"
    H = wh.shape[0]
    C = wo.shape[0]
    Hp = _round_up(H, 128)
    Cp = _round_up(C, 128)

    def pad2(a, rows, cols):
        r, c = a.shape
        return jnp.pad(a.astype(jnp.float32), ((0, rows - r), (0, cols - c)))

    wh_t = jnp.transpose(wh)                  # (2H, H): rows [:H] act on x, [H:] on h
    wo_t = jnp.transpose(wo)                  # (2H, C)
    whx = pad2(wh_t[:H, :], Hp, Hp)
    whh = pad2(wh_t[H:, :], Hp, Hp)
    wox = pad2(wo_t[:H, :], Hp, Cp)
    woh = pad2(wo_t[H:, :], Hp, Cp)
    bh_p = pad2(bh.reshape(1, H), 1, Hp)
    bo_p = pad2(bo.reshape(1, C), 1, Cp)

    # h_{T-1} = [x_0 | x_1 | ... | x_{T-2}] @ stack_t(Whx @ Whh^(T-2-t))
    #           + bh @ sum_{k=0}^{T-2} Whh^k
    blocks = [None] * (T - 1)
    cur = whx                                  # Whx @ Whh^0
    blocks[T - 2] = cur
    for e in range(1, T - 1):
        cur = jnp.dot(cur, whh)                # Whx @ Whh^e
        blocks[T - 2 - e] = cur
    mh = jnp.concatenate(blocks, axis=0)       # ((T-1)*Hp, Hp)

    bvec = bh_p
    bh_eff = bh_p
    for e in range(1, T - 1):
        bvec = jnp.dot(bvec, whh)              # bh @ Whh^e
        bh_eff = bh_eff + bvec                 # (1, Hp)

    return (mh, bh_eff, wox, woh, bo_p)


@functools.partial(jax.jit, static_argnames=("num_class",))
def mlp_rnn_classifier_fwd(params, x, y, *, num_class):
    """x: (B,T,H) f32, y: (B,) int.  Whole per-call path is one jitted dispatch."""
    mh, bh_eff, wox, woh, bo = params
    Hp = mh.shape[1]
    Cp = wox.shape[1]
    B, T, H = x.shape

    # Lane-pad each step to Hp and flatten t-major -> lane-dense (B, T*Hp) slab.
    x_p = jnp.pad(x.astype(jnp.float32), ((0, 0), (0, 0), (0, Hp - H)))
    x_p = x_p.reshape(B, T * Hp)

    vmem = lambda: pl.BlockSpec(memory_space=pltpu.MemorySpace.VMEM)

    # No grid: resident footprint < 1 MiB of VMEM.  (v7x: add a leading
    # "parallel" batch grid axis only if B grows beyond a few sublanes.)
    logp_p = pl.pallas_call(
        functools.partial(_rnn_kernel, num_class=num_class, hp=Hp),
        out_shape=jax.ShapeDtypeStruct((B, Cp), jnp.float32),
        in_specs=[vmem() for _ in range(6)],
        out_specs=vmem(),
    )(x_p, mh, bh_eff, wox, woh, bo)

    logp = logp_p[:, :num_class]

    # Tiny scalar epilogue (nll mean + accuracy) stays in the same jit -> fused.
    y32 = y.astype(jnp.int32)
    loss = -jnp.mean(jnp.take_along_axis(logp, y32[:, None], axis=1))
    pred = jnp.argmax(logp, axis=1)            # first-occurrence argmax, as torch
    acc = jnp.mean((pred == y32).astype(jnp.float32))
    return logp, loss, acc


def _reference(x, y, wh, bh, wo, bo):
    B, T, H = x.shape
    h = jnp.zeros((B, H), jnp.float32)
    logits = None
    for t in range(T):
        comb = jnp.concatenate([x[:, t, :], h], axis=1)
        logits = comb @ wo.T + bo              # pre-update hidden, as in torch
        h = comb @ wh.T + bh
    logp = jax.nn.log_softmax(logits, axis=1)
    loss = -jnp.mean(logp[jnp.arange(B), y])
    pred = jnp.argmax(logp, axis=1)
    acc = jnp.mean((pred == y).astype(jnp.float32))
    return logp, loss, acc


if __name__ == "__main__":
    B, T, H, C = 4, 8, 32, 10   # batch, seq, input_size(=hidden_size), num_class

    key = jax.random.PRNGKey(0)
    k1, k2, k3, k4, k5, k6 = jax.random.split(key, 6)
    # deterministic synthetic parameters (module's weights_init replaced)
    wh = jax.random.normal(k1, (H, 2 * H), jnp.float32) * 0.1   # i2h.weight
    bh = jax.random.normal(k2, (H,), jnp.float32) * 0.1         # i2h.bias
    wo = jax.random.normal(k3, (C, 2 * H), jnp.float32) * 0.1   # i2o.weight
    bo = jax.random.normal(k4, (C,), jnp.float32) * 0.1         # i2o.bias

    x = jax.random.normal(k5, (B, T, H), jnp.float32)
    y = jax.random.randint(k6, (B,), 0, C, jnp.int32)

    # One-time parameter preprocessing (transpose / pad / recurrence fold).
    params = prepare_params(wh, bh, wo, bo, T)
    jax.block_until_ready(params)

    logp, loss, acc = mlp_rnn_classifier_fwd(params, x, y, num_class=C)
    jax.block_until_ready((logp, loss, acc))

    ref_logp, ref_loss, ref_acc = _reference(x, y, wh, bh, wo, bo)
    np.testing.assert_allclose(np.asarray(logp), np.asarray(ref_logp),
                               rtol=1e-3, atol=1e-3)
    np.testing.assert_allclose(float(loss), float(ref_loss), rtol=1e-3, atol=1e-3)
    np.testing.assert_allclose(float(acc), float(ref_acc), rtol=1e-6, atol=1e-6)

    print("KERNEL_OK")
</pallas_src>

<mosaic_0001>
module attributes {stable_mosaic.version = 11 : i64} {
  func.func @_rnn_kernel(%arg0: memref<4x1024xf32, #tpu.memory_space<vmem>>, %arg1: memref<896x128xf32, #tpu.memory_space<vmem>>, %arg2: memref<1x128xf32, #tpu.memory_space<vmem>>, %arg3: memref<128x128xf32, #tpu.memory_space<vmem>>, %arg4: memref<128x128xf32, #tpu.memory_space<vmem>>, %arg5: memref<1x128xf32, #tpu.memory_space<vmem>>, %arg6: memref<4x128xf32, #tpu.memory_space<vmem>>) attributes {dimension_semantics = [], scalar_prefetch = 0 : i64, scratch_operands = 0 : i64, tpu.core_type = #tpu.core_type<tc>} {
    %c0 = arith.constant 0 : index
    %c0_0 = arith.constant 0 : index
    %0 = vector.load %arg0[%c0, %c0_0] : memref<4x1024xf32, #tpu.memory_space<vmem>>, vector<4x1024xf32>
    %1 = vector.extract_strided_slice %0 {offsets = [0, 0], sizes = [4, 896], strides = [1, 1]} : vector<4x1024xf32> to vector<4x896xf32>
    %2 = vector.extract_strided_slice %0 {offsets = [0, 896], sizes = [4, 128], strides = [1, 1]} : vector<4x1024xf32> to vector<4x128xf32>
    %c0_1 = arith.constant 0 : index
    %c0_2 = arith.constant 0 : index
    %3 = vector.load %arg1[%c0_1, %c0_2] : memref<896x128xf32, #tpu.memory_space<vmem>>, vector<896x128xf32>
    %cst = arith.constant dense<0.000000e+00> : vector<4x128xf32>
    %4 = tpu.matmul %1, %3, %cst {dimension_numbers = #tpu.dot_dimension_numbers<[1], [0], [0], [1], [0, 0, 1, 1], [], []>} : vector<4x896xf32>, vector<896x128xf32>, vector<4x128xf32> -> vector<4x128xf32>
    %c0_3 = arith.constant 0 : index
    %c0_4 = arith.constant 0 : index
    %5 = vector.load %arg2[%c0_3, %c0_4] : memref<1x128xf32, #tpu.memory_space<vmem>>, vector<1x128xf32>
    %6 = vector.broadcast %5 : vector<1x128xf32> to vector<4x128xf32>
    %7 = arith.addf %4, %6 : vector<4x128xf32>
    %c0_5 = arith.constant 0 : index
    %c0_6 = arith.constant 0 : index
    %8 = vector.load %arg3[%c0_5, %c0_6] : memref<128x128xf32, #tpu.memory_space<vmem>>, vector<128x128xf32>
    %cst_7 = arith.constant dense<0.000000e+00> : vector<4x128xf32>
    %9 = tpu.matmul %2, %8, %cst_7 {dimension_numbers = #tpu.dot_dimension_numbers<[1], [0], [0], [1], [0, 0, 1, 1], [], []>} : vector<4x128xf32>, vector<128x128xf32>, vector<4x128xf32> -> vector<4x128xf32>
    %c0_8 = arith.constant 0 : index
    %c0_9 = arith.constant 0 : index
    %10 = vector.load %arg4[%c0_8, %c0_9] : memref<128x128xf32, #tpu.memory_space<vmem>>, vector<128x128xf32>
    %cst_10 = arith.constant dense<0.000000e+00> : vector<4x128xf32>
    %11 = tpu.matmul %7, %10, %cst_10 {dimension_numbers = #tpu.dot_dimension_numbers<[1], [0], [0], [1], [0, 0, 1, 1], [], []>} : vector<4x128xf32>, vector<128x128xf32>, vector<4x128xf32> -> vector<4x128xf32>
    %12 = arith.addf %9, %11 : vector<4x128xf32>
    %c0_11 = arith.constant 0 : index
    %c0_12 = arith.constant 0 : index
    %13 = vector.load %arg5[%c0_11, %c0_12] : memref<1x128xf32, #tpu.memory_space<vmem>>, vector<1x128xf32>
    %14 = vector.broadcast %13 : vector<1x128xf32> to vector<4x128xf32>
    %15 = arith.addf %12, %14 : vector<4x128xf32>
    %16 = tpu.iota {dimensions = array<i32: 1>} : vector<4x128xi32>
    %c10_i32 = arith.constant 10 : i32
    %17 = vector.broadcast %c10_i32 : i32 to vector<4x128xi32>
    %18 = arith.cmpi slt, %16, %17 : vector<4x128xi32>
    %cst_13 = arith.constant -1.000000e+30 : f32
    %19 = vector.broadcast %cst_13 : f32 to vector<4x128xf32>
    %20 = arith.select %18, %15, %19 : vector<4x128xi1>, vector<4x128xf32>
    %cst_14 = arith.constant dense<0xFF800000> : vector<4xf32>
    %21 = vector.multi_reduction <maximumf>, %20, %cst_14 [1] : vector<4x128xf32> to vector<4xf32>
    %22 = vector.shape_cast %21 : vector<4xf32> to vector<4x1xf32>
    %23 = vector.broadcast %22 : vector<4x1xf32> to vector<4x128xf32>
    %24 = arith.subf %20, %23 : vector<4x128xf32>
    %25 = math.exp %24 : vector<4x128xf32>
    %cst_15 = arith.constant dense<0.000000e+00> : vector<4xf32>
    %26 = vector.multi_reduction <add>, %25, %cst_15 [1] : vector<4x128xf32> to vector<4xf32>
    %27 = vector.shape_cast %26 : vector<4xf32> to vector<4x1xf32>
    %28 = math.log %27 : vector<4x1xf32>
    %29 = vector.broadcast %28 : vector<4x1xf32> to vector<4x128xf32>
    %30 = arith.subf %24, %29 : vector<4x128xf32>
    %c0_16 = arith.constant 0 : index
    %c0_17 = arith.constant 0 : index
    %31 = vector.load %arg6[%c0_16, %c0_17] : memref<4x128xf32, #tpu.memory_space<vmem>>, vector<4x128xf32>
    tpu.vector_store %arg6[%c0_16, %c0_17], %30 {strides = array<i32>} : memref<4x128xf32, #tpu.memory_space<vmem>>, vector<4x128xf32>,
    return
  }
}

</mosaic_0001>

<bundles_post_ra>
// kernel: mlp_rnn_classifier_fwd.1
= control target key start
LH: loop header
LB: loop body
LE: loop exit
PB: predicated region body
PF: predicated region fallthrough
CT: control target
= control target key end

     0   :  { %11 = vsyncpa [#allocation3], 0  ;;  %s623_s0 = inlined_call_operand.vmem [shape: f32[4,1024], index: 0, kind: input, shape index: {}]   ;;  %s624_s1 = inlined_call_operand.hbm [shape: f32[896,128], index: 1, kind: input, shape index: {}]   ;;  %s625_s2 = inlined_call_operand.vmem [shape: f32[1,128], index: 2, kind: input, shape index: {}]   ;;  %s626_s3 = inlined_call_operand.vmem [shape: f32[128,128], index: 3, kind: input, shape index: {}]   ;;  %s627_s4 = inlined_call_operand.hbm [shape: f32[128,128], index: 4, kind: input, shape index: {}]   ;;  %s628_s5 = inlined_call_operand.vmem [shape: f32[1,128], index: 5, kind: input, shape index: {}]   ;;  %s629_s6 = inlined_call_operand.vmem [shape: f32[4,128], index: 6, kind: output, shape index: {}]  }
   0x1   :  { %s19_s23 = sshll.u32 %s624_s1, 4  ;;  %s20_s23 = int_to_ptr.hbm [resolvable:$true] %s19_s23 }
   0x2   :  { %12 = vsyncpa [#allocation5], 0  ;;  %s506_s24 = smov [#allocation2]   ;;  %s36_s28 = sshll.u32 %s627_s4, 4  ;;  %s37_s28 = int_to_ptr.hbm [resolvable:$true] %s36_s28 }
   0x3   :  { %s21_s25 = sshll.u32 %s506_s24, 4  ;;  %s507_s29 = smov 128   ;;  %s22_s25 = int_to_ptr.vmem [resolvable:$true] %s21_s25 }
   0x4   :  { %s508_s30 = smov 8   ;;  %s509_s7 = smov [#allocation4]  }
   0x5   :  { %27 = dma.hbm_to_vmem [thread:$0]  %s20_s23, 14336, %s22_s25, [#allocation3], %s507_s29, %s507_s29, %s508_s30  }
   0x6   :  { %s38_s8 = sshll.u32 %s509_s7, 4  ;;  %s39_s8 = int_to_ptr.vmem [resolvable:$true] %s38_s8 }
   0x7   :  { %44 = dma.hbm_to_vmem [thread:$0]  %s37_s28, 2048, %s39_s8, [#allocation5], %s507_s29, %s507_s29, %s508_s30  }
   0x8   :  { %502 = dma.done.wait [#allocation3], 14336  }
   0x9   :  { %503 = vsyncadd [#allocation3], 4294952960 }
   0xa   :  { %504 = dma.done.wait [#allocation5], 2048  }
   0xb   :  { %505 = vsyncadd [#allocation5], 4294965248  ;;  %v106_v0 = vld [vmem:[#allocation2 + $0x178] sm:$0xff]  ;;  %v105_v2 = vld [vmem:[#allocation2 + $0x170] sm:$0xff]  ;;  %vm424_vm1 = vcmask 1043456  }
   0xc   :  { %v74_v1 = vld [vmem:[#allocation2 + $0x78] sm:$0xff]  ;;  %240 = vmatpush.msra.mxu2 %v106_v0  ;;  %v73_v3 = vld [vmem:[#allocation2 + $0x70] sm:$0xff]  ;;  %v104_v5 = vld [vmem:[#allocation2 + $0x168] sm:$0xff] }
   0xd   :  { %200 = vmatpush.msra.mxu0 %v74_v1  ;;  %v90_v4 = vld [vmem:[#allocation2 + $0xf8] sm:$0xff]  ;;  %v72_v6 = vld [vmem:[#allocation2 + $0x68] sm:$0xff]  ;;  %v89_v7 = vld [vmem:[#allocation2 + $0xf0] sm:$0xff] }
   0xe   :  { %220 = vmatpush.msra.mxu1 %v90_v4  ;;  %241 = vmatpush.msra.mxu2 %v105_v2  ;;  %v88_v8 = vld [vmem:[#allocation2 + $0xe8] sm:$0xff]  ;;  %v103_v9 = vld [vmem:[#allocation2 + $0x160] sm:$0xff]  ;;  %v102_v12 = vld [vmem:[#allocation2 + $0x158] sm:$0xff] }
   0xf   :  { %201 = vmatpush.msra.mxu0 %v73_v3  ;;  %v71_v10 = vld [vmem:[#allocation2 + $0x60] sm:$0xff]  ;;  %v70_v13 = vld [vmem:[#allocation2 + $0x58] sm:$0xff]  ;;  %v101_v15 = vld [vmem:[#allocation2 + $0x150] sm:$0xff] }
  0x10   :  { %221 = vmatpush.msra.mxu1 %v89_v7  ;;  %242 = vmatpush.msra.mxu2 %v104_v5  ;;  %v87_v11 = vld [vmem:[#allocation2 + $0xe0] sm:$0xff]  ;;  %v86_v14 = vld [vmem:[#allocation2 + $0xd8] sm:$0xff]  ;;  %v69_v16 = vld [vmem:[#allocation2 + $0x50] sm:$0xff] }
  0x11   :  { %202 = vmatpush.msra.mxu0 %v72_v6  ;;  %v85_v17 = vld [vmem:[#allocation2 + $0xd0] sm:$0xff]  ;;  %v100_v18 = vld [vmem:[#allocation2 + $0x148] sm:$0xff]  ;;  %v99_v21 = vld [vmem:[#allocation2 + $0x140] sm:$0xff] }
  0x12   :  { %222 = vmatpush.msra.mxu1 %v88_v8  ;;  %243 = vmatpush.msra.mxu2 %v103_v9  ;;  %v68_v19 = vld [vmem:[#allocation2 + $0x48] sm:$0xff]  ;;  %v67_v22 = vld [vmem:[#allocation2 + $0x40] sm:$0xff]  ;;  %v122_v23 = vld [vmem:[#allocation2 + $0x1f8] sm:$0xff] }
  0x13   :  { %203 = vmatpush.msra.mxu0 %v71_v10  ;;  %v84_v20 = vld [vmem:[#allocation2 + $0xc8] sm:$0xff]  ;;  %v83_v24 = vld [vmem:[#allocation2 + $0xc0] sm:$0xff]  ;;  %v121_v25 = vld [vmem:[#allocation2 + $0x1f0] sm:$0xff]  ;;  %260 = vmatpush.msra.mxu3 %v122_v23 }
  0x14   :  { %223 = vmatpush.msra.mxu1 %v87_v11  ;;  %244 = vmatpush.msra.mxu2 %v102_v12  ;;  %v98_v26 = vld [vmem:[#allocation2 + $0x138] sm:$0xff]  ;;  %v120_v29 = vld [vmem:[#allocation2 + $0x1e8] sm:$0xff]  ;;  %v97_v30 = vld [vmem:[#allocation2 + $0x130] sm:$0xff] }
  0x15   :  { %204 = vmatpush.msra.mxu0 %v70_v13  ;;  %v66_v27 = vld [vmem:[#allocation2 + $0x38] sm:$0xff]  ;;  %v65_v31 = vld [vmem:[#allocation2 + $0x30] sm:$0xff]  ;;  %261 = vmatpush.msra.mxu3 %v121_v25  ;;  %v119_v33 = vld [vmem:[#allocation2 + $0x1e0] sm:$0xff] }
  0x16   :  { %224 = vmatpush.msra.mxu1 %v86_v14  ;;  %245 = vmatpush.msra.mxu2 %v101_v15  ;;  %v82_v28 = vld [vmem:[#allocation2 + $0xb8] sm:$0xff]  ;;  %v81_v32 = vld [vmem:[#allocation2 + $0xb0] sm:$0xff]  ;;  %v96_v34 = vld [vmem:[#allocation2 + $0x128] sm:$0xff] }
  0x17   :  { %205 = vmatpush.msra.mxu0 %v69_v16  ;;  %v64_v35 = vld [vmem:[#allocation2 + $0x28] sm:$0xff]  ;;  %262 = vmatpush.msra.mxu3 %v120_v29  ;;  %v118_v37 = vld [vmem:[#allocation2 + $0x1d8] sm:$0xff]  ;;  %v95_v38 = vld [vmem:[#allocation2 + $0x120] sm:$0xff] }
  0x18   :  { %225 = vmatpush.msra.mxu1 %v85_v17  ;;  %246 = vmatpush.msra.mxu2 %v100_v18  ;;  %v80_v36 = vld [vmem:[#allocation2 + $0xa8] sm:$0xff]  ;;  %v63_v39 = vld [vmem:[#allocation2 + $0x20] sm:$0xff]  ;;  %v117_v41 = vld [vmem:[#allocation2 + $0x1d0] sm:$0xff] }
  0x19   :  { %206 = vmatpush.msra.mxu0 %v68_v19  ;;  %263 = vmatpush.msra.mxu3 %v119_v33  ;;  %v79_v40 = vld [vmem:[#allocation2 + $0xa0] sm:$0xff]  ;;  %v94_v42 = vld [vmem:[#allocation2 + $0x118] sm:$0xff]  ;;  %v116_v45 = vld [vmem:[#allocation2 + $0x1c8] sm:$0xff] }
  0x1a   :  { %226 = vmatpush.msra.mxu1 %v84_v20  ;;  %247 = vmatpush.msra.mxu2 %v99_v21  ;;  %v62_v43 = vld [vmem:[#allocation2 + $0x18] sm:$0xff]  ;;  %v93_v46 = vld [vmem:[#allocation2 + $0x110] sm:$0xff]  ;;  %v115_v49 = vld [vmem:[#allocation2 + $0x1c0] sm:$0xff] }
  0x1b   :  { %207 = vmatpush.msra.mxu0 %v67_v22  ;;  %264 = vmatpush.msra.mxu3 %v118_v37  ;;  %v78_v44 = vld [vmem:[#allocation2 + $0x98] sm:$0xff]  ;;  %v61_v47 = vld [vmem:[#allocation2 + $0x10] sm:$0xff]  ;;  %v92_v50 = vld [vmem:[#allocation2 + $0x108] sm:$0xff] }
  0x1c   :  { %227 = vmatpush.msra.mxu1 %v83_v24  ;;  %248 = vmatpush.msra.mxu2 %v98_v26  ;;  %v77_v48 = vld [vmem:[#allocation2 + $0x90] sm:$0xff]  ;;  %v60_v51 = vld [vmem:[#allocation2 + $0x8] sm:$0xff]  ;;  %v114_v53 = vld [vmem:[#allocation2 + $0x1b8] sm:$0xff] }
  0x1d   :  { %208 = vmatpush.msra.mxu0 %v66_v27  ;;  %265 = vmatpush.msra.mxu3 %v117_v41  ;;  %v76_v52 = vld [vmem:[#allocation2 + $0x88] sm:$0xff]  ;;  %v91_v54 = vld [vmem:[#allocation2 + $0x100] sm:$0xff]  ;;  %v170_v56 = vld [vmem:[#allocation2 + $0x378] sm:$0xff] }
  0x1e   :  { %228 = vmatpush.msra.mxu1 %v82_v28  ;;  %249 = vmatpush.msra.mxu2 %v97_v30  ;;  %v59_v55 = vld [vmem:[#allocation2] sm:$0xff]  ;;  %v138_v57 = vld [vmem:[#allocation2 + $0x278] sm:$0xff]  ;;  %v113_v59 = vld [vmem:[#allocation2 + $0x1b0] sm:$0xff] }
  0x1f   :  { %209 = vmatpush.msra.mxu0 %v65_v31  ;;  %266 = vmatpush.msra.mxu3 %v116_v45  ;;  %v75_v58 = vld [vmem:[#allocation2 + $0x80] sm:$0xff]  ;;  %v169_v60 = vld [vmem:[#allocation2 + $0x370] sm:$0xff]  ;;  %v154_v62 = vld [vmem:[#allocation2 + $0x2f8] sm:$0xff] }
  0x20   :  { %229 = vmatpush.msra.mxu1 %v81_v32  ;;  %250 = vmatpush.msra.mxu2 %v96_v34  ;;  %v137_v61 = vld [vmem:[#allocation2 + $0x270] sm:$0xff]  ;;  %v112_v63 = vld [vmem:[#allocation2 + $0x1a8] sm:$0xff]  ;;  %v56_v0 = vld [vmem:[%s623_s0 + $0x8] sm:$0xff] }
  0x21   :  { %210 = vmatpush.msra.mxu0 %v64_v35  ;;  %267 = vmatpush.msra.mxu3 %v115_v49  ;;  %v168_v1 = vld [vmem:[#allocation2 + $0x368] sm:$0xff]  ;;  %181 = vst [vmem:[#allocation1 + $0x10] ss:$2 sm:$0xff] %v56_v0  ;;  %v55_v3 = vld [vmem:[%s623_s0] sm:$0xff]  ;;  %v153_v4 = vld [vmem:[#allocation2 + $0x2f0] sm:$0xff] }
  0x22   :  { %230 = vmatpush.msra.mxu1 %v80_v36  ;;  %251 = vmatpush.msra.mxu2 %v95_v38  ;;  %v136_v2 = vld [vmem:[#allocation2 + $0x268] sm:$0xff]  ;;  %v111_v5 = vld [vmem:[#allocation2 + $0x1a0] sm:$0xff]  ;;  %179 = vst [vmem:[#allocation1] ss:$2 sm:$0xff] %v55_v3  ;;  %v58_v8 = vld [vmem:[%s623_s0 + $0x18] sm:$0xff] }
  0x23   :  { %211 = vmatpush.msra.mxu0 %v63_v39  ;;  %268 = vmatpush.msra.mxu3 %v114_v53  ;;  %v167_v6 = vld [vmem:[#allocation2 + $0x360] sm:$0xff]  ;;  %v152_v9 = vld [vmem:[#allocation2 + $0x2e8] sm:$0xff]  ;;  %v110_v10 = vld [vmem:[#allocation2 + $0x198] sm:$0xff]  ;;  %185 = vst [vmem:[#allocation1 + $0x30] ss:$2 sm:$0xff] %v58_v8 }
  0x24   :  { %231 = vmatpush.msra.mxu1 %v79_v40  ;;  %252 = vmatpush.msra.mxu2 %v94_v42  ;;  %v135_v7 = vld [vmem:[#allocation2 + $0x260] sm:$0xff]  ;;  %v166_v11 = vld [vmem:[#allocation2 + $0x358] sm:$0xff]  ;;  %v109_v14 = vld [vmem:[#allocation2 + $0x190] sm:$0xff] }
  0x25   :  { %212 = vmatpush.msra.mxu0 %v62_v43  ;;  %269 = vmatpush.msra.mxu3 %v113_v59  ;;  %v134_v12 = vld [vmem:[#allocation2 + $0x258] sm:$0xff]  ;;  %v151_v13 = vld [vmem:[#allocation2 + $0x2e0] sm:$0xff]  ;;  %v57_v15 = vld [vmem:[%s623_s0 + $0x10] sm:$0xff] }
  0x26   :  { %232 = vmatpush.msra.mxu1 %v78_v44  ;;  %253 = vmatpush.msra.mxu2 %v93_v46  ;;  %v165_v16 = vld [vmem:[#allocation2 + $0x350] sm:$0xff]  ;;  %v150_v18 = vld [vmem:[#allocation2 + $0x2d8] sm:$0xff]  ;;  %183 = vst [vmem:[#allocation1 + $0x20] ss:$2 sm:$0xff] %v57_v15  ;;  %v164_v19 = vld [vmem:[#allocation2 + $0x348] sm:$0xff] }
  0x27   :  { %213 = vmatpush.msra.mxu0 %v61_v47  ;;  %270 = vmatpush.msra.mxu3 %v112_v63  ;;  %v133_v17 = vld [vmem:[#allocation2 + $0x250] sm:$0xff]  ;;  %v132_v20 = vld [vmem:[#allocation2 + $0x248] sm:$0xff]  ;;  %v163_v26 = vld [vmem:[#allocation2 + $0x340] sm:$0xff] }
  0x28   :  { %233 = vmatpush.msra.mxu1 %v77_v48  ;;  %254 = vmatpush.msra.mxu2 %v92_v50  ;;  %v108_v21 = vld [vmem:[#allocation2 + $0x188] sm:$0xff]  ;;  %v149_v24 = vld [vmem:[#allocation2 + $0x2d0] sm:$0xff]  ;;  %v131_v27 = vld [vmem:[#allocation2 + $0x240] sm:$0xff] }
  0x29   :  { %214 = vmatpush.msra.mxu0 %v60_v51  ;;  %271 = vmatpush.msra.mxu3 %v111_v5  ;;  %v186_v22 = vld.sshfl [vmem:[#allocation1] sm:$0xff pattern:$0x75316420]  ;;  %v563_v23 = vld.sshfl [vmem:[#allocation1 + $0x8] sm:$0xff pattern:$0x75316420] }
  0x2a   :  { %234 = vmatpush.msra.mxu1 %v76_v52  ;;  %255 = vmatpush.msra.mxu2 %v91_v54  ;;  %v188_v25 = vld.sshfl [vmem:[#allocation1 + $0x10] sm:$0xff pattern:$0x75316420]  ;;  %392 = vst [vmem:[#allocation1] ss:$2 sm:$0xff] %v58_v8  ;;  %v107_v29 = vld [vmem:[#allocation2 + $0x180] sm:$0xff] }
  0x2b   :  { %215 = vmatpush.msra.mxu0 %v59_v55  ;;  %272 = vmatpush.msra.mxu3 %v110_v10  ;;  %v148_v28 = vld [vmem:[#allocation2 + $0x2c8] sm:$0xff]  ;;  %v162_v30 = vld [vmem:[#allocation2 + $0x338] sm:$0xff]  ;;  %v147_v32 = vld [vmem:[#allocation2 + $0x2c0] sm:$0xff] }
  0x2c   :  { %320 = vmatpush.msrb.mxu2 %v170_v56  ;;  %235 = vmatpush.msra.mxu1 %v75_v58  ;;  %v130_v31 = vld [vmem:[#allocation2 + $0x238] sm:$0xff]  ;;  %v161_v33 = vld [vmem:[#allocation2 + $0x330] sm:$0xff]  ;;  %v160_v37 = vld [vmem:[#allocation2 + $0x328] sm:$0xff] }
  0x2d   :  { %280 = vmatpush.msrb.mxu0 %v138_v57  ;;  %273 = vmatpush.msra.mxu3 %v109_v14  ;;  %v129_v34 = vld [vmem:[#allocation2 + $0x230] sm:$0xff]  ;;  %v146_v35 = vld [vmem:[#allocation2 + $0x2b8] sm:$0xff]  ;;  %v128_v38 = vld [vmem:[#allocation2 + $0x228] sm:$0xff] }
  0x2e   :  { %321 = vmatpush.msrb.mxu2 %v169_v60  ;;  %300 = vmatpush.msrb.mxu1 %v154_v62  ;;  %v189_v36 = vld.sshfl [vmem:[#allocation1 + $0x18] sm:$0xff pattern:$0x75316420]  ;;  %v371_v40 = vld [vmem:[#allocation4 + $0x78] sm:$0xff]  ;;  %v159_v41 = vld [vmem:[#allocation2 + $0x320] sm:$0xff] }
  0x2f   :  { %281 = vmatpush.msrb.mxu0 %v137_v61  ;;  %274 = vmatpush.msra.mxu3 %v108_v21  ;;  %v145_v39 = vld [vmem:[#allocation2 + $0x2b0] sm:$0xff]  ;;  %v127_v42 = vld [vmem:[#allocation2 + $0x220] sm:$0xff]  ;;  %v144_v43 = vld [vmem:[#allocation2 + $0x2a8] sm:$0xff] }
  0x30   :  { %322 = vmatpush.msrb.mxu2 %v168_v1  ;;  %301 = vmatpush.msrb.mxu1 %v153_v4  ;;  %v370_v44 = vld [vmem:[#allocation4 + $0x70] sm:$0xff]  ;;  %v158_v45 = vld [vmem:[#allocation2 + $0x318] sm:$0xff]  ;;  %v143_v47 = vld [vmem:[#allocation2 + $0x2a0] sm:$0xff] }
  0x31   :  { %282 = vmatpush.msrb.mxu0 %v136_v2  ;;  %256 = vmatmul.f32.vlgmr.msra.gmra.mxu2 %v188_v25  ;;  %v126_v46 = vld [vmem:[#allocation2 + $0x218] sm:$0xff]  ;;  %v369_v48 = vld [vmem:[#allocation4 + $0x68] sm:$0xff]  ;;  %v157_v49 = vld [vmem:[#allocation2 + $0x310] sm:$0xff] }
  0x32   :  { %323 = vmatpush.msrb.mxu2 %v167_v6  ;;  %302 = vmatpush.msrb.mxu1 %v152_v9  ;;  %v125_v50 = vld [vmem:[#allocation2 + $0x210] sm:$0xff]  ;;  %v142_v51 = vld [vmem:[#allocation2 + $0x298] sm:$0xff]  ;;  %v156_v52 = vld [vmem:[#allocation2 + $0x308] sm:$0xff] }
  0x33   :  { %283 = vmatpush.msrb.mxu0 %v135_v7  ;;  %275 = vmatpush.msra.mxu3 %v107_v29  ;;  %v368_v53 = vld [vmem:[#allocation4 + $0x60] sm:$0xff]  ;;  %v124_v54 = vld [vmem:[#allocation2 + $0x208] sm:$0xff]  ;;  %v141_v55 = vld [vmem:[#allocation2 + $0x290] sm:$0xff] }
  0x34   :  { %324 = vmatpush.msrb.mxu2 %v166_v11  ;;  %303 = vmatpush.msrb.mxu1 %v151_v13  ;;  %v155_v56 = vld [vmem:[#allocation2 + $0x300] sm:$0xff]  ;;  %v367_v57 = vld [vmem:[#allocation4 + $0x58] sm:$0xff]  ;;  %v192_v58 = vld.sshfl [vmem:[#allocation1 + $0x30] sm:$0xff pattern:$0x75316420] }
  0x35   :  { %284 = vmatpush.msrb.mxu0 %v134_v12  ;;  %276 = vmatmul.f32.vlgmr.msra.gmra.mxu3 %v189_v36  ;;  %v123_v59 = vld [vmem:[#allocation2 + $0x200] sm:$0xff]  ;;  %v140_v60 = vld [vmem:[#allocation2 + $0x288] sm:$0xff]  ;;  %v190_v61 = vld.sshfl [vmem:[#allocation1 + $0x20] sm:$0xff pattern:$0x75316420] }
  0x36   :  { %325 = vmatpush.msrb.mxu2 %v165_v16  ;;  %304 = vmatpush.msrb.mxu1 %v150_v18  ;;  %v355_v62 = vld [vmem:[%s626_s3 + $0x78] sm:$0xff]  ;;  %v139_v0 = vld [vmem:[#allocation2 + $0x280] sm:$0xff]  ;;  %v354_v2 = vld [vmem:[%s626_s3 + $0x70] sm:$0xff] }
  0x37   :  { %285 = vmatpush.msrb.mxu0 %v133_v17  ;;  %372 = vmatpush.msrb.mxu3 %v371_v40  ;;  %v366_v63 = vld [vmem:[#allocation4 + $0x50] sm:$0xff]  ;;  %v191_v1 = vld.sshfl [vmem:[#allocation1 + $0x28] sm:$0xff pattern:$0x75316420]  ;;  %v365_v3 = vld [vmem:[#allocation4 + $0x48] sm:$0xff] }
  0x38   :  { %326 = vmatpush.msrb.mxu2 %v164_v19  ;;  %305 = vmatpush.msrb.mxu1 %v149_v24  ;;  %v353_v4 = vld [vmem:[%s626_s3 + $0x68] sm:$0xff]  ;;  %v352_v6 = vld [vmem:[%s626_s3 + $0x60] sm:$0xff]  ;;  %v351_v7 = vld [vmem:[%s626_s3 + $0x58] sm:$0xff] }
  0x39   :  { %286 = vmatpush.msrb.mxu0 %v132_v20  ;;  %373 = vmatpush.msrb.mxu3 %v370_v44  ;;  %v364_v5 = vld [vmem:[#allocation4 + $0x40] sm:$0xff]  ;;  %v363_v8 = vld [vmem:[#allocation4 + $0x38] sm:$0xff]  ;;  %v350_v9 = vld [vmem:[%s626_s3 + $0x50] sm:$0xff] }
  0x3a   :  { %327 = vmatpush.msrb.mxu2 %v163_v26  ;;  %306 = vmatpush.msrb.mxu1 %v148_v28  ;;  %v362_v10 = vld [vmem:[#allocation4 + $0x30] sm:$0xff]  ;;  %v349_v11 = vld [vmem:[%s626_s3 + $0x48] sm:$0xff]  ;;  %v361_v12 = vld [vmem:[#allocation4 + $0x28] sm:$0xff] }
  0x3b   :  { %287 = vmatpush.msrb.mxu0 %v131_v27  ;;  %374 = vmatpush.msrb.mxu3 %v369_v48  ;;  %v348_v13 = vld [vmem:[%s626_s3 + $0x40] sm:$0xff]  ;;  %v360_v14 = vld [vmem:[#allocation4 + $0x20] sm:$0xff]  ;;  %v347_v15 = vld [vmem:[%s626_s3 + $0x38] sm:$0xff] }
  0x3c   :  { %328 = vmatpush.msrb.mxu2 %v162_v30  ;;  %307 = vmatpush.msrb.mxu1 %v147_v32  ;;  %v359_v16 = vld [vmem:[#allocation4 + $0x18] sm:$0xff]  ;;  %v346_v17 = vld [vmem:[%s626_s3 + $0x30] sm:$0xff]  ;;  %v358_v18 = vld [vmem:[#allocation4 + $0x10] sm:$0xff] }
  0x3d   :  { %288 = vmatpush.msrb.mxu0 %v130_v31  ;;  %236 = vmatmul.f32.vlgmr.msra.gmra.mxu1 %v563_v23  ;;  %v345_v19 = vld [vmem:[%s626_s3 + $0x28] sm:$0xff]  ;;  %v357_v20 = vld [vmem:[#allocation4 + $0x8] sm:$0xff]  ;;  %v344_v21 = vld [vmem:[%s626_s3 + $0x20] sm:$0xff] }
  0x3e   :  { %216 = vmatmul.f32.vlgmr.msra.gmra.mxu0 %v186_v22  ;;  %329 = vmatpush.msrb.mxu2 %v161_v33  ;;  %v356_v22 = vld [vmem:[#allocation4] sm:$0xff]  ;;  %v343_v23 = vld [vmem:[%s626_s3 + $0x18] sm:$0xff]  ;;  %v342_v24 = vld [vmem:[%s626_s3 + $0x10] sm:$0xff] }
  0x3f   :  { %289 = vmatpush.msrb.mxu0 %v129_v34  ;;  %308 = vmatpush.msrb.mxu1 %v146_v35  ;;  %v341_v25 = vld [vmem:[%s626_s3 + $0x8] sm:$0xff]  ;;  %v340_v26 = vld [vmem:[%s626_s3] sm:$0xff] }
  0x40   :  { %330 = vmatpush.msrb.mxu2 %v160_v37  ;;  %375 = vmatpush.msrb.mxu3 %v368_v53  ;;  %v393_v27 = vld.sshfl [vmem:[#allocation1 + $0x8] sm:$0xff pattern:$0x75316420]  ;;  %v448_v28 = vld [vmem:[%s625_s2] ss:$0 sm:$0xff] }
  0x41   :  { %290 = vmatpush.msrb.mxu0 %v128_v38  ;;  %309 = vmatpush.msrb.mxu1 %v145_v39 }
  0x42   :  { %331 = vmatpush.msrb.mxu2 %v159_v41  ;;  %376 = vmatpush.msrb.mxu3 %v367_v57 }
  0x43   :  { %291 = vmatpush.msrb.mxu0 %v127_v42  ;;  %310 = vmatpush.msrb.mxu1 %v144_v43  ;;  %v420_v43 = vlaneseq }
  0x44   :  { %332 = vmatpush.msrb.mxu2 %v158_v45  ;;  %377 = vmatpush.msrb.mxu3 %v366_v63 }
  0x45   :  { %292 = vmatpush.msrb.mxu0 %v126_v46  ;;  %311 = vmatpush.msrb.mxu1 %v143_v47  ;;  %v421_v45 = vand.u32 127, %v420_v43  ;;  %v449_v46 = vld [vmem:[%s628_s5] ss:$0 sm:$0xff] }
  0x46   :  { %333 = vmatpush.msrb.mxu2 %v157_v49  ;;  %378 = vmatpush.msrb.mxu3 %v365_v3 }
  0x47   :  { %293 = vmatpush.msrb.mxu0 %v125_v50  ;;  %312 = vmatpush.msrb.mxu1 %v142_v51  ;;  %vm422_vm0 = vcmp.lt.s32.totalorder %v421_v45, 10 }
  0x48   :  { %334 = vmatpush.msrb.mxu2 %v156_v52  ;;  %379 = vmatpush.msrb.mxu3 %v364_v5 }
  0x49   :  { %294 = vmatpush.msrb.mxu0 %v124_v54  ;;  %313 = vmatpush.msrb.mxu1 %v141_v55 }
  0x4a   :  { %335 = vmatpush.msrb.mxu2 %v155_v56  ;;  %380 = vmatpush.msrb.mxu3 %v363_v8 }
  0x4b   :  { %336 = vmatmul.f32.vlgmr.msrb.gmra.mxu2 %v192_v58  ;;  %295 = vmatpush.msrb.mxu0 %v123_v59 }
  0x4c   :  { %314 = vmatpush.msrb.mxu1 %v140_v60  ;;  %296 = vmatmul.f32.vlgmr.msrb.gmra.mxu0 %v190_v61 }
  0x4d   :  { %395 = vmatpush.msra.mxu0 %v355_v62  ;;  %381 = vmatpush.msrb.mxu3 %v362_v10 }
  0x4e   :  { %315 = vmatpush.msrb.mxu1 %v139_v0 }
  0x4f   :  { %316 = vmatmul.f32.vlgmr.msrb.gmra.mxu1 %v191_v1  ;;  %396 = vmatpush.msra.mxu0 %v354_v2 }
  0x50   :  { %382 = vmatpush.msrb.mxu3 %v361_v12 }
  0x51   :  { %397 = vmatpush.msra.mxu0 %v353_v4 }
  0x52   :  { %383 = vmatpush.msrb.mxu3 %v360_v14 }
  0x53   :  { %398 = vmatpush.msra.mxu0 %v352_v6 }
  0x54   :  { %384 = vmatpush.msrb.mxu3 %v359_v16 }
  0x55   :  { %399 = vmatpush.msra.mxu0 %v351_v7 }
  0x56   :  { %385 = vmatpush.msrb.mxu3 %v358_v18 }
  0x57   :  { %400 = vmatpush.msra.mxu0 %v350_v9 }
  0x58   :  { %386 = vmatpush.msrb.mxu3 %v357_v20 }
  0x59   :  { %401 = vmatpush.msra.mxu0 %v349_v11 }
  0x5a   :  { %387 = vmatpush.msrb.mxu3 %v356_v22 }
  0x5b   :  { %402 = vmatpush.msra.mxu0 %v348_v13 }
  0x5d   :  { %403 = vmatpush.msra.mxu0 %v347_v15 }
  0x5f   :  { %404 = vmatpush.msra.mxu0 %v346_v17 }
  0x61   :  { %405 = vmatpush.msra.mxu0 %v345_v19 }
  0x63   :  { %406 = vmatpush.msra.mxu0 %v344_v21 }
  0x65   :  { %407 = vmatpush.msra.mxu0 %v343_v23 }
  0x67   :  { %408 = vmatpush.msra.mxu0 %v342_v24 }
  0x69   :  { %409 = vmatpush.msra.mxu0 %v341_v25 }
  0x6b   :  { %410 = vmatpush.msra.mxu0 %v340_v26 }
  0x6c   :  { %411 = vmatmul.f32.vlgmr.msra.gmra.mxu0 %v393_v27 }
  0xb4   :  { %v257_v32 = vpop.f32.mrf.mxu2 }
  0xb8   :  { %v277_v34 = vpop.f32.mrf.mxu3 }
  0xba   :  { %v237_v31 = vpop.f32.mrf.mxu1 }
  0xbb   :  { %v217_v29 = vpop.f32.mrf.mxu0 }
  0xbc   :  { %v218_v30 = vadd.f32 %v448_v28, %v217_v29 }
  0xbe   :  { %v238_v33 = vadd.f32 %v237_v31, %v218_v30 }
  0xc0   :  { %v258_v35 = vadd.f32 %v257_v32, %v238_v33 }
  0xc2   :  { %v278_v36 = vadd.f32 %v277_v34, %v258_v35 }
  0xc9   :  { %v297_v37 = vpop.f32.mrf.mxu0 }
  0xca   :  { %v298_v38 = vadd.f32 %v297_v37, %v278_v36 }
  0xcc   :  { %v317_v39 = vpop.f32.mrf.mxu1 }
  0xcd   :  { %v318_v40 = vadd.f32 %v317_v39, %v298_v38 }
  0xce   :  { %v337_v41 = vpop.f32.mrf.mxu2 }
  0xcf   :  { %v338_v42 = vadd.f32 %v337_v41, %v318_v40 }
  0xd1   :  { %388 = vmatmul.f32.vlgmr.msrb.gmra.mxu3 %v338_v42 }
  0xe9   :  { %v412_v44 = vpop.f32.mrf.mxu0 }
 0x154   :  { %v389_v47 = vpop.f32.mrf.mxu3 }
 0x155   :  { %v413_v48 = vadd.f32 %v412_v44, %v389_v47 }
 0x157   :  { %v419_v49 = vadd.f32 %v449_v46, %v413_v48 }
 0x159   :  { %v423_v50 = vsel %vm422_vm0, %v419_v49, -1e+30 }
 0x15a   :  { %v425_v51 = vsel %vm424_vm1, %v423_v50, -inf }
 0x15b   :  { %426 = vmax.xlane.f32.xlu0 %v425_v51 }
 0x1ce   :  { %v427_v52 = vpop.xlane.xlu0 %426 }
 0x1cf   :  { %v428_v53 = vsub.f32 %v423_v50, %v427_v52 }
 0x1d1   :  { %v429_v54 = vmul.f32 1.442695, %v428_v53 }
 0x1d3   :  { %450 = vpow2.f32 %v429_v54 }
 0x1d9   :  { %v451_v55 = vpop.eup %450 }
 0x1da   :  { %v431_v56 = vsel %vm424_vm1, %v451_v55, 0.0 }
 0x1db   :  { %432 = vadd.xlane.f32.xlu0 %v431_v56 }
 0x24e   :  { %v433_v57 = vpop.xlane.xlu0 %432 }
 0x24f   :  { %452 = vlog2.f32 %v433_v57 }
 0x255   :  { %v453_v58 = vpop.eup %452 }
 0x256   :  { %v435_v59 = vmul.f32 0.6931472, %v453_v58 }
 0x258   :  { %v436_v60 = vsub.f32 %v428_v53, %v435_v59 }
 0x25a   :  { %437 = vst [vmem:[%s629_s6] sm:$0xf] %v436_v60 }
 0x25b   :  { %442 = vsyncpa [#allocation3], 1 }
 0x25c   :  { %443 = vsyncpa [#allocation5], 1 }

</bundles_post_ra>
